<compile_context>
chip_gen: v7x
topology: tpu7x:2x2x1
jax: 0.10.0
libtpu: 0.0.40
codegen_flags: <defaults>
</compile_context>

<pallas_src>
import jax
import jax.numpy as jnp
from jax.experimental import pallas as pl
from jax.experimental.pallas import tpu as pltpu


def _round_up(x: int, m: int) -> int:
    return (x + m - 1) // m * m


def _pad_to(x, shape):
    pads = [(0, t - s) for s, t in zip(x.shape, shape)]
    if any(p[1] for p in pads):
        x = jnp.pad(x, pads)
    return x


def film_fusion_kernel(v_ref, a_ref, wgb_ref, bgb_ref, wf_ref, bf_ref, o_ref):
    """gamma|beta = a @ Wgb + bgb ; mod_v = v*(1+gamma)+beta ; out = mod_v @ Wf + bf."""
    v_dim_p = v_ref.shape[-1]  # already padded to a multiple of 128

    # Fused, lane-dense MXU matmul for [gamma | beta]; feed the MXU in the
    # weight dtype (bf16 fast path), accumulate in f32.
    a_mxu = a_ref[...].astype(wgb_ref.dtype)
    gb = jnp.dot(a_mxu, wgb_ref[...], preferred_element_type=jnp.float32)
    gb = gb + bgb_ref[...].astype(jnp.float32)

    # v_dim_p is a multiple of 128 -> whole-vreg (copy-free) split.
    gamma = gb[:, :v_dim_p]
    beta = gb[:, v_dim_p:]

    # FiLM elementwise math in f32 (required on v5e; cheap everywhere).
    v = v_ref[...].astype(jnp.float32)
    mod_v = v * (1.0 + gamma) + beta

    # Output projection: cast to the weight dtype for the MXU, f32 accumulation.
    out = jnp.dot(mod_v.astype(wf_ref.dtype), wf_ref[...],
                  preferred_element_type=jnp.float32)
    out = out + bf_ref[...].astype(jnp.float32)
    o_ref[...] = out.astype(o_ref.dtype)


def film_fusion(v, a, params, *, block_b: int = 512, weight_dtype=jnp.bfloat16):
    """Batched FiLM fusion.

    v: [B, v_dim], a: [B, a_dim]
    params: wg [a_dim, v_dim], bg [1, v_dim],
            wb [a_dim, v_dim], bb [1, v_dim],
            wf [v_dim, out_dim], bf [1, out_dim]
    Weights are stored [in_dim, out_dim] (transposed vs. nn.Linear.weight).
    """
    B, v_dim = v.shape
    _, a_dim = a.shape
    out_dim = params["wf"].shape[1]
    out_dtype = v.dtype

    # --- Batch tile selection -------------------------------------------------
    bb = _round_up(max(8, int(block_b)), 8)
    if B >= 16:
        # Keep >= 2 grid steps so v7x's 2 TensorCores both get work on the
        # "parallel" batch axis; on 1-TC chips this costs ~nothing at bb>=128.
        bb = min(bb, _round_up((B + 1) // 2, 8))
    bb = min(bb, _round_up(B, 8))
    B_p = _round_up(B, bb)
    grid = (B_p // bb,)

    # --- Host-side (one-time) parameter packing & padding ----------------------
    v_dim_p = _round_up(v_dim, 128)     # lane-aligned gamma/beta split
    out_dim_p = _round_up(out_dim, 128)  # lane-dense (unmasked) output stores

    wg_p = _pad_to(params["wg"], (a_dim, v_dim_p)).astype(weight_dtype)
    wb_p = _pad_to(params["wb"], (a_dim, v_dim_p)).astype(weight_dtype)
    wgb = jnp.concatenate([wg_p, wb_p], axis=1)                  # [a_dim, 2*v_dim_p]
    bg_p = _pad_to(params["bg"], (1, v_dim_p))
    bb_p = _pad_to(params["bb"], (1, v_dim_p))
    bgb = jnp.concatenate([bg_p, bb_p], axis=1).astype(jnp.float32)  # [1, 2*v_dim_p]

    wf = _pad_to(params["wf"], (v_dim_p, out_dim_p)).astype(weight_dtype)
    bf = _pad_to(params["bf"], (1, out_dim_p)).astype(jnp.float32)

    v_p = _pad_to(v, (B_p, v_dim_p))
    a_p = _pad_to(a, (B_p, a_dim))

    # --- VMEM budget ------------------------------------------------------------
    w_isz = jnp.dtype(weight_dtype).itemsize
    o_isz = jnp.dtype(out_dtype).itemsize
    vmem_bytes = (
        3 * bb * (v_dim_p * v_p.dtype.itemsize + a_dim * a_p.dtype.itemsize)  # act in
        + 3 * bb * out_dim_p * o_isz                                          # out
        + 2 * (wgb.size * w_isz + wf.size * w_isz + bgb.size * 4 + bf.size * 4)
        + 4 * bb * (3 * v_dim_p + out_dim_p)                                  # f32 temps
        + (4 << 20)                                                           # headroom
    )
    vmem_limit = int(min(max(vmem_bytes, 32 << 20), 64 << 20))  # valid on v7x too

    # --- Cost estimate ------------------------------------------------------------
    flops = 2 * B_p * (a_dim * 2 * v_dim_p + v_dim_p * out_dim_p) + 3 * B_p * v_dim_p
    bytes_accessed = (
        B_p * (v_dim_p * v_p.dtype.itemsize + a_dim * a_p.dtype.itemsize
               + out_dim_p * o_isz)
        + wgb.size * w_isz + wf.size * w_isz + bgb.size * 4 + bf.size * 4
    )
    cost = pl.CostEstimate(flops=int(flops), transcendentals=0,
                           bytes_accessed=int(bytes_accessed))

    # --- Pallas call ----------------------------------------------------------------
    def build(act_buffers, weight_buffers):
        def spec(shape, index_map, nbuf):
            if nbuf is None:
                return pl.BlockSpec(shape, index_map)
            return pl.BlockSpec(shape, index_map, pipeline_mode=pl.Buffered(nbuf))

        return pl.pallas_call(
            film_fusion_kernel,
            out_shape=jax.ShapeDtypeStruct((B_p, out_dim_p), out_dtype),
            grid=grid,
            in_specs=[
                # activations: tiled along the batch grid axis
                spec((bb, v_dim_p), lambda i: (i, 0), act_buffers),
                spec((bb, a_dim), lambda i: (i, 0), act_buffers),
                # weights/biases: VMEM-resident across all grid steps
                spec((a_dim, 2 * v_dim_p), lambda i: (0, 0), weight_buffers),
                spec((1, 2 * v_dim_p), lambda i: (0, 0), weight_buffers),
                spec((v_dim_p, out_dim_p), lambda i: (0, 0), weight_buffers),
                spec((1, out_dim_p), lambda i: (0, 0), weight_buffers),
            ],
            out_specs=spec((bb, out_dim_p), lambda i: (i, 0), act_buffers),
            compiler_params=pltpu.CompilerParams(
                dimension_semantics=("parallel",),
                vmem_limit_bytes=vmem_limit),
            cost_estimate=cost,
        )

    args = (v_p, a_p, wgb, bgb, wf, bf)
    try:
        # Preferred: single-buffered constant weights, 3-deep activation/output pipeline.
        out_padded = jax.block_until_ready(build(3, 1)(*args))
    except Exception:
        # pipeline_mode=pl.Buffered(...) unsupported in this build -> default pipeline.
        out_padded = build(None, None)(*args)

    # TODO(synk): for very large out_dim add a second grid axis tiling wf/bf/out
    # along out_dim_p (keeps the resident weight slab under v7x's 64 MiB VMEM).
    return out_padded[:B, :out_dim]


def init_params(key, v_dim, a_dim, out_dim, dtype=jnp.float32):
    """Deterministic synthetic parameters (PyTorch-Linear-like uniform init)."""
    ks = jax.random.split(key, 6)

    def linear(kw, kb, fan_in, fan_out):
        bound = 1.0 / jnp.sqrt(fan_in)
        w = jax.random.uniform(kw, (fan_in, fan_out), dtype, -bound, bound)
        b = jax.random.uniform(kb, (1, fan_out), dtype, -bound, bound)
        return w, b

    wg, bg = linear(ks[0], ks[1], a_dim, v_dim)
    wb, bb = linear(ks[2], ks[3], a_dim, v_dim)
    wf, bf = linear(ks[4], ks[5], v_dim, out_dim)
    return {"wg": wg, "bg": bg, "wb": wb, "bb": bb, "wf": wf, "bf": bf}


def film_fusion_ref(v, a, p):
    gamma = a @ p["wg"] + p["bg"]
    beta = a @ p["wb"] + p["bb"]
    mod_v = v * (1.0 + gamma) + beta
    return mod_v @ p["wf"] + p["bf"]


if __name__ == "__main__":
    # Small-but-MXU-relevant shapes: two batch tiles of 128 rows after capping.
    B, v_dim, a_dim, out_dim = 256, 64, 32, 32

    key = jax.random.PRNGKey(0)
    k_v, k_a, k_p = jax.random.split(key, 3)

    v = jax.random.normal(k_v, (B, v_dim), jnp.float32)
    a = jax.random.normal(k_a, (B, a_dim), jnp.float32)
    params = init_params(k_p, v_dim, a_dim, out_dim)

    ref = film_fusion_ref(v, a, params)

    # Exact path: f32 weights on the MXU, tight tolerance vs. the reference.
    out_f32 = jax.block_until_ready(
        film_fusion(v, a, params, weight_dtype=jnp.float32))
    assert out_f32.shape == (B, out_dim)
    assert jnp.allclose(out_f32, ref, atol=1e-3, rtol=1e-3), "f32 path mismatch"

    # Default perf path: bf16 weights on the MXU (f32 accumulation); looser tol.
    out_bf16 = jax.block_until_ready(film_fusion(v, a, params))
    assert out_bf16.shape == (B, out_dim)
    assert jnp.allclose(out_bf16, ref, atol=5e-2, rtol=5e-2), "bf16 path mismatch"

    print("KERNEL_OK")
</pallas_src>

<mosaic_0001>
module attributes {stable_mosaic.version = 11 : i64} {
  func.func @film_fusion_kernel(%arg0: i32, %arg1: memref<128x128xf32, #tpu.memory_space<vmem>>, %arg2: memref<128x32xf32, #tpu.memory_space<vmem>>, %arg3: memref<32x256xf32, #tpu.memory_space<vmem>>, %arg4: memref<1x256xf32, #tpu.memory_space<vmem>>, %arg5: memref<128x128xf32, #tpu.memory_space<vmem>>, %arg6: memref<1x128xf32, #tpu.memory_space<vmem>>, %arg7: memref<128x128xf32, #tpu.memory_space<vmem>>) attributes {dimension_semantics = [#tpu.dimension_semantics<parallel>], iteration_bounds = array<i64: 2>, scalar_prefetch = 0 : i64, scratch_operands = 0 : i64, tpu.core_type = #tpu.core_type<tc>, window_params = [{transform_indices = @transform_0, window_bounds = array<i64: 128, 128>}, {transform_indices = @transform_1, window_bounds = array<i64: 128, 32>}, {pipeline_mode = #tpu.pipeline_mode<synchronous>, transform_indices = @transform_2, window_bounds = array<i64: 32, 256>}, {pipeline_mode = #tpu.pipeline_mode<synchronous>, transform_indices = @transform_3, window_bounds = array<i64: 1, 256>}, {pipeline_mode = #tpu.pipeline_mode<synchronous>, transform_indices = @transform_4, window_bounds = array<i64: 128, 128>}, {pipeline_mode = #tpu.pipeline_mode<synchronous>, transform_indices = @transform_5, window_bounds = array<i64: 1, 128>}, {transform_indices = @transform_6, window_bounds = array<i64: 128, 128>}]} {
    %c0 = arith.constant 0 : index
    %c0_0 = arith.constant 0 : index
    %0 = vector.load %arg2[%c0, %c0_0] : memref<128x32xf32, #tpu.memory_space<vmem>>, vector<128x32xf32>
    %c0_1 = arith.constant 0 : index
    %c0_2 = arith.constant 0 : index
    %1 = vector.load %arg3[%c0_1, %c0_2] : memref<32x256xf32, #tpu.memory_space<vmem>>, vector<32x256xf32>
    %cst = arith.constant dense<0.000000e+00> : vector<128x256xf32>
    %2 = tpu.matmul %0, %1, %cst {dimension_numbers = #tpu.dot_dimension_numbers<[1], [0], [0], [1], [0, 0, 1, 1], [], []>} : vector<128x32xf32>, vector<32x256xf32>, vector<128x256xf32> -> vector<128x256xf32>
    %c0_3 = arith.constant 0 : index
    %c0_4 = arith.constant 0 : index
    %3 = vector.load %arg4[%c0_3, %c0_4] : memref<1x256xf32, #tpu.memory_space<vmem>>, vector<1x256xf32>
    %4 = vector.broadcast %3 : vector<1x256xf32> to vector<128x256xf32>
    %5 = arith.addf %2, %4 : vector<128x256xf32>
    %6 = vector.extract_strided_slice %5 {offsets = [0, 0], sizes = [128, 128], strides = [1, 1]} : vector<128x256xf32> to vector<128x128xf32>
    %7 = vector.extract_strided_slice %5 {offsets = [0, 128], sizes = [128, 128], strides = [1, 1]} : vector<128x256xf32> to vector<128x128xf32>
    %c0_5 = arith.constant 0 : index
    %c0_6 = arith.constant 0 : index
    %8 = vector.load %arg1[%c0_5, %c0_6] : memref<128x128xf32, #tpu.memory_space<vmem>>, vector<128x128xf32>
    %cst_7 = arith.constant 1.000000e+00 : f32
    %9 = vector.broadcast %cst_7 : f32 to vector<128x128xf32>
    %10 = arith.addf %9, %6 : vector<128x128xf32>
    %11 = arith.mulf %8, %10 : vector<128x128xf32>
    %12 = arith.addf %11, %7 : vector<128x128xf32>
    %c0_8 = arith.constant 0 : index
    %c0_9 = arith.constant 0 : index
    %13 = vector.load %arg5[%c0_8, %c0_9] : memref<128x128xf32, #tpu.memory_space<vmem>>, vector<128x128xf32>
    %cst_10 = arith.constant dense<0.000000e+00> : vector<128x128xf32>
    %14 = tpu.matmul %12, %13, %cst_10 {dimension_numbers = #tpu.dot_dimension_numbers<[1], [0], [0], [1], [0, 0, 1, 1], [], []>} : vector<128x128xf32>, vector<128x128xf32>, vector<128x128xf32> -> vector<128x128xf32>
    %c0_11 = arith.constant 0 : index
    %c0_12 = arith.constant 0 : index
    %15 = vector.load %arg6[%c0_11, %c0_12] : memref<1x128xf32, #tpu.memory_space<vmem>>, vector<1x128xf32>
    %16 = vector.broadcast %15 : vector<1x128xf32> to vector<128x128xf32>
    %17 = arith.addf %14, %16 : vector<128x128xf32>
    %c0_13 = arith.constant 0 : index
    %c0_14 = arith.constant 0 : index
    %18 = vector.load %arg7[%c0_13, %c0_14] : memref<128x128xf32, #tpu.memory_space<vmem>>, vector<128x128xf32>
    tpu.vector_store %arg7[%c0_13, %c0_14], %17 {strides = array<i32>} : memref<128x128xf32, #tpu.memory_space<vmem>>, vector<128x128xf32>,
    return
  }
  func.func @transform_0(%arg0: i32) -> (i32, i32) {
    %c0_i32 = arith.constant 0 : i32
    %c0_i32_0 = arith.constant 0 : i32
    return %arg0, %c0_i32 : i32, i32
  }
  func.func @transform_1(%arg0: i32) -> (i32, i32) {
    %c0_i32 = arith.constant 0 : i32
    %c0_i32_0 = arith.constant 0 : i32
    return %arg0, %c0_i32 : i32, i32
  }
  func.func @transform_2(%arg0: i32) -> (i32, i32) {
    %c0_i32 = arith.constant 0 : i32
    %c0_i32_0 = arith.constant 0 : i32
    %c0_i32_1 = arith.constant 0 : i32
    return %c0_i32, %c0_i32_0 : i32, i32
  }
  func.func @transform_3(%arg0: i32) -> (i32, i32) {
    %c0_i32 = arith.constant 0 : i32
    %c0_i32_0 = arith.constant 0 : i32
    %c0_i32_1 = arith.constant 0 : i32
    return %c0_i32, %c0_i32_0 : i32, i32
  }
  func.func @transform_4(%arg0: i32) -> (i32, i32) {
    %c0_i32 = arith.constant 0 : i32
    %c0_i32_0 = arith.constant 0 : i32
    %c0_i32_1 = arith.constant 0 : i32
    return %c0_i32, %c0_i32_0 : i32, i32
  }
  func.func @transform_5(%arg0: i32) -> (i32, i32) {
    %c0_i32 = arith.constant 0 : i32
    %c0_i32_0 = arith.constant 0 : i32
    %c0_i32_1 = arith.constant 0 : i32
    return %c0_i32, %c0_i32_0 : i32, i32
  }
  func.func @transform_6(%arg0: i32) -> (i32, i32) {
    %c0_i32 = arith.constant 0 : i32
    %c0_i32_0 = arith.constant 0 : i32
    return %arg0, %c0_i32 : i32, i32
  }
}

</mosaic_0001>

<bundles_post_ra>
// kernel: tpu_custom_call.1
= control target key start
LH: loop header
LB: loop body
LE: loop exit
PB: predicated region body
PF: predicated region fallthrough
CT: control target
= control target key end

     0   :  { %11 = vsyncpa [#allocation3], 0  ;;  %s1543_s0 = inlined_call_operand.vmem [shape: f32[256,128], index: 0, kind: input, shape index: {}]   ;;  %s1544_s1 = inlined_call_operand.vmem [shape: f32[256,32], index: 1, kind: input, shape index: {}]   ;;  %s1545_s2 = inlined_call_operand.vmem [shape: f32[32,256], index: 2, kind: input, shape index: {}]   ;;  %s1546_s3 = inlined_call_operand.vmem [shape: f32[1,256], index: 3, kind: input, shape index: {}]   ;;  %s1547_s4 = inlined_call_operand.hbm [shape: f32[128,128], index: 4, kind: input, shape index: {}]   ;;  %s1548_s5 = inlined_call_operand.vmem [shape: f32[1,128], index: 5, kind: input, shape index: {}]   ;;  %s1549_s6 = inlined_call_operand.hbm [shape: f32[256,128], index: 6, kind: output, shape index: {}]  }
   0x1   :  { %12 = vsyncpa [#allocation4], 0 }
   0x2   :  { %14 = vsyncpa [#allocation4 + $0x1], 0  ;;  %s1239_s21 = smov 0   ;;  %s1241_s22 = smov 0  }
   0x3   :  { %s1243_s23 = smov 0   ;;  %s1245_s24 = smov 0  }
   0x4 LB: > { %s1260_s25 = sadd.s32 4294967295, %s1195_s24   ;;  %s884_s26 = sadd.s32 4294967294, %s1195_s24   ;;  %s1195_s24 = sphi %s1245_s24, %s1565_s24   ;;  %s1191_s23 = sphi %s1243_s23, %s1564_s23   ;;  %s1187_s22 = sphi %s1241_s22, %s1563_s22   ;;  %s1183_s21 = sphi %s1239_s21, %s1562_s21  }
   0x5   : > { %s1264_s27 = sadd.s32 1, %s1195_s24   ;;  %s163_s28 = sadd.s32 1, %s1191_s23 }
   0x6   : > { %s160_s29 = ssub.s32 %s1195_s24, %s1264_s27  ;;  %p173_p0 = scmp.ne.s32.totalorder %s1191_s23, %s1187_s22 }
   0x7   : > { %p161_p1 = scmp.eq.s32.totalorder %s160_s29, 0  ;;  %p174_p2 = scmp.eq.s32.totalorder %s1260_s25, 1 }
   0x8   : > { %p179_p3 = scmp.ne.s32.totalorder %s1187_s22, %s1183_s21  ;;  %p180_p4 = scmp.eq.s32.totalorder %s884_s26, 1 }
   0x9   : > { %s1275_s30 = scalar_select %p161_p1, %s1191_s23, %s163_s28  }
   0xa   : > { %p1277_p5 = por %p174_p2, %p173_p0  ;;  %p1281_p6 = por %p180_p4, %p179_p3 }
   0xb   : > { %p885_p7 = scmp.ge.s32.totalorder %s1195_s24, 1  ;;  %p187_p8 = scmp.lt.s32.totalorder %s1195_s24, 3 }
   0xc   : > { %s1553_s7 = scalar_select %p1277_p5, 1, 0 }
   0xd   : > { %s1554_s8 = scalar_select %p1281_p6, 1, 0 }
   0xe   : > { %p1550_p9 = scmp.eq.s32.totalorder %s1260_s25, 0  ;;  %p1288_p10 = pnand %p885_p7, %p187_p8 }
   0xf   : > { %s1197_s10 = smov [#allocation2]   ;;  %s1101_s15 = scalar_lea.hbm %s1547_s4, 2048 }
  0x10   : > { %s1555_s9 = scalar_select %p1288_p10, 1, 0 }
  0x11   : > { %s205_s11 = sshll.u32 %s1197_s10, 4  ;;  %p1052_p11 = pneg %p1288_p10  ;;  %s206_s11 = int_to_ptr.vmem [resolvable:$true] %s205_s11 }
  0x12   : > { %p1102_p13 = scmp.ne.s32.totalorder %s1547_s4, %s1101_s15  ;;  %p1108_p3 = scmp.lt.u32.totalorder %s1101_s15, %s1547_s4 }
  0x13   : > { %p1296_p12 = pnand %p1550_p9, %p1052_p11 }
  0x15   : > { %p1103_p0 = pneg %p1296_p12 }
  0x17   : > { %p1104_p1 = pnand %p1103_p0, %p1102_p13 }
  0x19   : > { %p1105_p2 = pneg %p1104_p1 }
  0x1b   : > { %p1110_p4 = pnand %p1108_p3, %p1105_p2 }
  0x1d   : > { %1113 = shalt.err (!%p1110_p4)
}
  0x1e   : > { %s1114_s20 = scalar_lea.vmem %s206_s11, 2048  ;;  %p1122_p9 = scmp.lt.s32.totalorder %s206_s11, %s206_s11 }
  0x1f   : > { %p1115_p7 = scmp.ne.s32.totalorder %s206_s11, %s1114_s20  ;;  %p1123_p6 = scmp.lt.s32.totalorder %s1114_s20, %s1114_s20 }
  0x21   : > { %p1117_p8 = pnand %p1115_p7, %p1103_p0  ;;  %p1124_p5 = por %p1123_p6, %p1122_p9 }
  0x23   : > { %p1118_p11 = pneg %p1117_p8 }
  0x25   : > { %p1125_p10 = pnand %p1124_p5, %p1118_p11 }
  0x27   : > { %1128 = shalt.err (!%p1125_p10)
}
  0x28   : > { %s1198_s26 = smov 128   ;;  %s1199_s28 = smov 8  }
  0x29   : > { %1055 = dma.hbm_to_vmem [thread:$0]  (!%p1296_p12), %s1547_s4, 2048, %s206_s11, [#allocation3], %s1198_s26, %s1198_s26, %s1199_s28  }
  0x2a   : > { %p1557_p13 = scmp.ne.s32.totalorder %s1555_s9, 0 }
  0x2b   : > { %p1558_p1 = scmp.eq.s32.totalorder (!%p1557_p13), %s1260_s25, 0 }
  0x2c   : > { %242 = sbr.rel (%p1557_p13) target bundleno = 573 (0x23d), region = 44 }
  0x33   : > { %1174 = dma.done.wait (%p1558_p1), [#allocation3], 2048   ;;  %p1559_p0 = pmov %p1558_p1 }
  0x34   : > { %s891_s13 = sshll.u32 %s1260_s25, 4  ;;  %v1200_v0 = vmov 0.0   ;;  %v307_v1 = vld [vmem:[%s1545_s2 + $0x8] sm:$0xff]  ;;  %v309_v2 = vld [vmem:[%s1545_s2 + $0x18] sm:$0xff]  ;;  %v306_v3 = vld [vmem:[%s1545_s2] sm:$0xff]  ;;  %vm326_vm0 = vcmask 261120   ;;  %v316_v53 = vlaneseq }
  0x35   : > { %1176 = vsyncadd (%p1559_p0), [#allocation3], 4294965248  ;;  %439 = vmatprep.mubr.f32.mxu0 %v1200_v0  ;;  %p278_p5 = scmp.lt.s32.totalorder %s891_s13, 31  ;;  %v1006_v4 = vpack.c.bf16 %v309_v2, %v307_v1  ;;  %v308_v5 = vld [vmem:[%s1545_s2 + $0x10] sm:$0xff]  ;;  %v311_v6 = vld [vmem:[%s1545_s2 + $0x28] sm:$0xff]  ;;  %s917_s14 = sshll.u32 %s1260_s25, 11 }
  0x36   : > { %v313_v7 = vld [vmem:[%s1545_s2 + $0x38] sm:$0xff]  ;;  %v1008_v8 = vpack.c.bf16 %v308_v5, %v306_v3  ;;  %v310_v10 = vld [vmem:[%s1545_s2 + $0x20] sm:$0xff]  ;;  %v312_v11 = vld [vmem:[%s1545_s2 + $0x30] sm:$0xff]  ;;  %v317_v54 = vshrl.u32 %v316_v53, 7  ;;  %p1560_p9 = scmp.ne.s32.totalorder %s1553_s7, 0  ;;  %s1201_s18 = smov [#allocation5]  }
  0x37   : > { %s1567_s13 = smov (!%p278_p5, %s891_s13), 31  ;;  %v1010_v9 = vpack.c.bf16 %v313_v7, %v311_v6  ;;  %1007 = vmatprep.subr.bf16.mxu0 %v1006_v4  ;;  %v1012_v12 = vpack.c.bf16 %v312_v11, %v310_v10  ;;  %v600_v14 = vld [vmem:[#allocation2] sm:$0xff]  ;;  %v601_v15 = vld [vmem:[#allocation2 + $0x8] sm:$0xff]  ;;  %v602_v16 = vld [vmem:[#allocation2 + $0x10] sm:$0xff]  ;;  %s1133_s19 = sshll.u32 %s1201_s18, 4  ;;  %s1134_s19 = int_to_ptr.vmem [resolvable:$false] %s1133_s19 }
  0x38   : > { %s892_s29 = sshll.u32 %s1567_s13, 3  ;;  %1009 = vmatpush1.bf16.msra.mxu0 %v1008_v8  ;;  %v1014_v17 = vpack.c.bf16 %v601_v15, %v600_v14  ;;  %v603_v18 = vld [vmem:[#allocation2 + $0x18] sm:$0xff]  ;;  %v604_v20 = vld [vmem:[#allocation2 + $0x20] sm:$0xff]  ;;  %v605_v21 = vld [vmem:[#allocation2 + $0x28] sm:$0xff]  ;;  %v318_v55 = vsub.s32 0, %v317_v54  ;;  %v322_v58 = vsub.s32 1, %v317_v54 }
  0x39   : > { %s1356_s16 = scalar_lea.vmem %s1544_s1, %s892_s29  ;;  %1011 = vmatprep.subr.bf16.mxu0 %v1010_v9  ;;  %v1018_v19 = vpack.c.bf16 %v603_v18, %v602_v16  ;;  %v1022_v23 = vpack.c.bf16 %v605_v21, %v604_v20  ;;  %v606_v24 = vld [vmem:[#allocation2 + $0x30] sm:$0xff]  ;;  %v607_v25 = vld [vmem:[#allocation2 + $0x38] sm:$0xff]  ;;  %v608_v28 = vld [vmem:[#allocation2 + $0x40] sm:$0xff]  ;;  %s1415_s26 = scalar_lea.vmem %s1543_s0, %s892_s29 }
  0x3a   : > { %v290_v13 = vld [vmem:[%s1356_s16] sm:$0xff]  ;;  %1015 = vmatprep.subr.bf16.mxu1 %v1014_v17  ;;  %v291_v22 = vld [vmem:[%s1356_s16 + $0x8] sm:$0xff]  ;;  %v292_v26 = vld [vmem:[%s1356_s16 + $0x10] sm:$0xff]  ;;  %v1026_v27 = vpack.c.bf16 %v607_v25, %v606_v24  ;;  %s274_s13 = sand.u32 1, %s1187_s22   ;;  %s1135_s20 = scalar_lea.vmem %s1134_s19, 4096 }
  0x3b   : > { %1017 = vmatpush3.bf16.msra.mxu1 %v1014_v17  ;;  %v609_v29 = vld [vmem:[#allocation2 + $0x48] sm:$0xff]  ;;  %v293_v30 = vld [vmem:[%s1356_s16 + $0x18] sm:$0xff]  ;;  %v294_v32 = vld [vmem:[%s1356_s16 + $0x20] sm:$0xff]  ;;  %s890_s28 = sshll.u32 %s274_s13, 7  ;;  %s1502_s17 = scalar_lea.sflag [#allocation4], %s274_s13 }
  0x3c   : > { %1013 = vmatpush1.bf16.msra.mxu0 %v1012_v12  ;;  %1019 = vmatprep.subr.bf16.mxu1 %v1018_v19  ;;  %v1030_v31 = vpack.c.bf16 %v609_v29, %v608_v28  ;;  %v295_v33 = vld [vmem:[%s1356_s16 + $0x28] sm:$0xff]  ;;  %v296_v34 = vld [vmem:[%s1356_s16 + $0x30] sm:$0xff]  ;;  %v297_v35 = vld [vmem:[%s1356_s16 + $0x38] sm:$0xff]  ;;  %s1473_s12 = scalar_lea.vmem [#allocation5], %s890_s28 }
  0x3d   : > { %v298_v36 = vld [vmem:[%s1356_s16 + $0x40] sm:$0xff]  ;;  %v299_v37 = vld [vmem:[%s1356_s16 + $0x48] sm:$0xff]  ;;  %v300_v38 = vld [vmem:[%s1356_s16 + $0x50] sm:$0xff]  ;;  %s798_s9 = sshll.u32 %s1473_s12, 4  ;;  %s1496_s9 = int_to_ptr.vmem [resolvable:$true] %s798_s9 }
  0x3e   : > { %v301_v39 = vld [vmem:[%s1356_s16 + $0x58] sm:$0xff]  ;;  %v302_v40 = vld [vmem:[%s1356_s16 + $0x60] sm:$0xff]  ;;  %v303_v41 = vld [vmem:[%s1356_s16 + $0x68] sm:$0xff]  ;;  %s1129_s25 = scalar_lea.vmem %s1496_s9, 2048  ;;  %p1136_p2 = scmp.lt.s32.totalorder %s1496_s9, %s1134_s19 }
  0x3f   : > { %895 = vmatmul.mubr.msk.f32.vlgmr.msra.gmra.mrb[0].mxu0 %vm326_vm0, %v290_v13  ;;  %1021 = vmatpush3.bf16.msra.mxu1 %v1018_v19  ;;  %v304_v42 = vld [vmem:[%s1356_s16 + $0x70] sm:$0xff]  ;;  %v305_v43 = vld [vmem:[%s1356_s16 + $0x78] sm:$0xff]  ;;  %v612_v47 = vld [vmem:[#allocation2 + $0x60] sm:$0xff]  ;;  %s1494_s16 = scalar_lea.hbm %s1549_s6, %s917_s14  ;;  %p1130_p6 = scmp.ne.s32.totalorder %s1496_s9, %s1129_s25 }
  0x40   : > { %445 = vmatprep.mubr.f32.mxu0 %v1200_v0  ;;  %1023 = vmatprep.subr.bf16.mxu1 %v1022_v23  ;;  %v610_v44 = vld [vmem:[#allocation2 + $0x50] sm:$0xff]  ;;  %v611_v45 = vld [vmem:[#allocation2 + $0x58] sm:$0xff]  ;;  %v613_v48 = vld [vmem:[#allocation2 + $0x68] sm:$0xff]  ;;  %p1137_p3 = scmp.lt.s32.totalorder %s1135_s20, %s1129_s25 }
  0x41   : > { %v1034_v46 = vpack.c.bf16 %v611_v45, %v610_v44  ;;  %v1038_v49 = vpack.c.bf16 %v613_v48, %v612_v47  ;;  %v614_v50 = vld [vmem:[#allocation2 + $0x70] sm:$0xff]  ;;  %v615_v51 = vld [vmem:[#allocation2 + $0x78] sm:$0xff]  ;;  %v314_v56 = vld [vmem:[%s1546_s3] sm:$0x3]  ;;  %p1131_p10 = pnand %p1130_p6, %p1560_p9 }
  0x42   : > { %v1042_v52 = vpack.c.bf16 %v615_v51, %v614_v50  ;;  %v1408_v57 = vrot.slane %v314_v56, %v318_v55  ;;  %v1418_v61 = vrot.slane %v314_v56, %v322_v58  ;;  %v536_v63 = vld [vmem:[%s1415_s26] sm:$0xff]  ;;  %v537_v6 = vld [vmem:[%s1415_s26 + $0x8] sm:$0xff]  ;;  %v538_v14 = vld [vmem:[%s1415_s26 + $0x10] sm:$0xff]  ;;  %p1138_p4 = por %p1137_p3, %p1136_p2 }
  0x43   : > { %896 = vmatmul.mubr.msk.f32.gmra.mrb[2].mxu0 %vm326_vm0, %v291_v22  ;;  %1025 = vmatpush3.bf16.msra.mxu1 %v1022_v23  ;;  %v539_v22 = vld [vmem:[%s1415_s26 + $0x18] sm:$0xff]  ;;  %p1132_p12 = pneg %p1131_p10 }
  0x44   : > { %451 = vmatprep.mubr.f32.mxu0 %v1200_v0  ;;  %1027 = vmatprep.subr.bf16.mxu1 %v1026_v27  ;;  %v543_v54 = vld [vmem:[%s1415_s26 + $0x38] sm:$0xff] }
  0x45   : > { %p1139_p7 = pnand %p1138_p4, %p1132_p12 }
  0x47   : > { %897 = vmatmul.mubr.msk.f32.gmra.mrb[4].mxu0 %vm326_vm0, %v292_v26  ;;  %1029 = vmatpush3.bf16.msra.mxu1 %v1026_v27 }
  0x48   : > { %457 = vmatprep.mubr.f32.mxu0 %v1200_v0  ;;  %1031 = vmatprep.subr.bf16.mxu1 %v1030_v31 }
  0x4b   : > { %898 = vmatmul.mubr.msk.f32.gmra.mrb[6].mxu0 %vm326_vm0, %v293_v30  ;;  %1033 = vmatpush3.bf16.msra.mxu1 %v1030_v31  ;;  %v540_v30 = vld [vmem:[%s1415_s26 + $0x20] sm:$0xff] }
  0x4c   : > { %463 = vmatprep.mubr.f32.mxu0 %v1200_v0  ;;  %1035 = vmatprep.subr.bf16.mxu1 %v1034_v46 }
  0x4f   : > { %899 = vmatmul.mubr.msk.f32.gmra.mrb[8].mxu0 %vm326_vm0, %v294_v32  ;;  %1037 = vmatpush3.bf16.msra.mxu1 %v1034_v46  ;;  %v542_v46 = vld [vmem:[%s1415_s26 + $0x30] sm:$0xff] }
  0x50   : > { %469 = vmatprep.mubr.f32.mxu0 %v1200_v0  ;;  %1039 = vmatprep.subr.bf16.mxu1 %v1038_v49 }
  0x53   : > { %900 = vmatmul.mubr.msk.f32.gmra.mrb[10].mxu0 %vm326_vm0, %v295_v33  ;;  %1041 = vmatpush3.bf16.msra.mxu1 %v1038_v49 }
  0x54   : > { %475 = vmatprep.mubr.f32.mxu0 %v1200_v0  ;;  %1043 = vmatprep.subr.bf16.mxu1 %v1042_v52 }
  0x57   : > { %901 = vmatmul.mubr.msk.f32.gmra.mrb[12].mxu0 %vm326_vm0, %v296_v34  ;;  %1045 = vmatpush3.bf16.msra.mxu1 %v1042_v52 }
  0x58   : > { %481 = vmatprep.mubr.f32.mxu0 %v1200_v0 }
  0x5b   : > { %902 = vmatmul.mubr.msk.f32.gmra.mrb[14].mxu0 %vm326_vm0, %v297_v35 }
  0x5c   : > { %487 = vmatprep.mubr.f32.mxu0 %v1200_v0 }
  0x5f   : > { %903 = vmatmul.mubr.msk.f32.gmra.mrb[16].mxu0 %vm326_vm0, %v298_v36 }
  0x60   : > { %493 = vmatprep.mubr.f32.mxu0 %v1200_v0 }
  0x63   : > { %904 = vmatmul.mubr.msk.f32.gmra.mrb[18].mxu0 %vm326_vm0, %v299_v37 }
  0x64   : > { %499 = vmatprep.mubr.f32.mxu0 %v1200_v0 }
  0x67   : > { %905 = vmatmul.mubr.msk.f32.gmra.mrb[20].mxu0 %vm326_vm0, %v300_v38  ;;  %v541_v38 = vld [vmem:[%s1415_s26 + $0x28] sm:$0xff] }
  0x68   : > { %505 = vmatprep.mubr.f32.mxu0 %v1200_v0 }
  0x6b   : > { %906 = vmatmul.mubr.msk.f32.gmra.mrb[22].mxu0 %vm326_vm0, %v301_v39 }
  0x6c   : > { %511 = vmatprep.mubr.f32.mxu0 %v1200_v0 }
  0x6f   : > { %907 = vmatmul.mubr.msk.f32.gmra.mrb[24].mxu0 %vm326_vm0, %v302_v40 }
  0x70   : > { %517 = vmatprep.mubr.f32.mxu0 %v1200_v0 }
  0x73   : > { %908 = vmatmul.mubr.msk.f32.gmra.mrb[26].mxu0 %vm326_vm0, %v303_v41 }
  0x74   : > { %523 = vmatprep.mubr.f32.mxu0 %v1200_v0 }
  0x77   : > { %909 = vmatmul.mubr.msk.f32.gmra.mrb[28].mxu0 %vm326_vm0, %v304_v42 }
  0x78   : > { %529 = vmatprep.mubr.f32.mxu0 %v1200_v0 }
  0x7b   : > { %910 = vmatmul.mubr.msk.f32.gmra.mrb[30].mxu0 %vm326_vm0, %v305_v43 }
 0x112   : > { %v441_v59 = vpop.f32.mrb[0].mxu0 }
 0x113   : > { %v442_v60 = vadd.f32 %v441_v59, %v1408_v57  ;;  %v443_v62 = vpop.f32.mrb[1].mxu0 }
 0x114   : > { %v444_v2 = vadd.f32 %v443_v62, %v1418_v61 }
 0x115   : > { %v552_v0 = vadd.f32 1.0, %v442_v60 }
 0x116   : > { %v447_v1 = vpop.f32.mrb[2].mxu0 }
 0x117   : > { %v448_v3 = vadd.f32 %v447_v1, %v1408_v57  ;;  %v449_v4 = vpop.f32.mrb[3].mxu0  ;;  %v568_v5 = vmul.f32 %v552_v0, %v536_v63  ;;  %v544_v0 = vld [vmem:[%s1415_s26 + $0x40] sm:$0xff] }
 0x118   : > { %v450_v11 = vadd.f32 %v449_v4, %v1418_v61 }
 0x119   : > { %v553_v7 = vadd.f32 1.0, %v448_v3  ;;  %v584_v8 = vadd.f32 %v568_v5, %v444_v2 }
 0x11a   : > { %v453_v9 = vpop.f32.mrb[4].mxu0 }
 0x11b   : > { %v569_v10 = vmul.f32 %v553_v7, %v537_v6  ;;  %v454_v12 = vadd.f32 %v453_v9, %v1408_v57  ;;  %v455_v13 = vpop.f32.mrb[5].mxu0  ;;  %982 = vmatprep.mubr.f32.mxu1 %v584_v8  ;;  %v545_v8 = vld [vmem:[%s1415_s26 + $0x48] sm:$0xff] }
 0x11c   : > { %v456_v19 = vadd.f32 %v455_v13, %v1418_v61 }
 0x11d   : > { %v585_v15 = vadd.f32 %v569_v10, %v450_v11  ;;  %v554_v16 = vadd.f32 1.0, %v454_v12 }
 0x11e   : > { %v459_v17 = vpop.f32.mrb[6].mxu0 }
 0x11f   : > { %v570_v18 = vmul.f32 %v554_v16, %v538_v14  ;;  %v460_v20 = vadd.f32 %v459_v17, %v1408_v57  ;;  %v461_v21 = vpop.f32.mrb[7].mxu0  ;;  %983 = vmatmul.mubr.f32.vlgmr.msra.gmra.mrb[0].mxu1 %v585_v15  ;;  %v546_v16 = vld [vmem:[%s1415_s26 + $0x50] sm:$0xff] }
 0x120   : > { %v462_v27 = vadd.f32 %v461_v21, %v1418_v61 }
 0x121   : > { %v586_v23 = vadd.f32 %v570_v18, %v456_v19  ;;  %v555_v24 = vadd.f32 1.0, %v460_v20 }
 0x122   : > { %v465_v25 = vpop.f32.mrb[8].mxu0 }
 0x123   : > { %v571_v26 = vmul.f32 %v555_v24, %v539_v22  ;;  %v466_v28 = vadd.f32 %v465_v25, %v1408_v57  ;;  %v467_v29 = vpop.f32.mrb[9].mxu0  ;;  %985 = vmatprep.mubr.f32.mxu1 %v586_v23  ;;  %v547_v24 = vld [vmem:[%s1415_s26 + $0x58] sm:$0xff] }
 0x124   : > { %v468_v35 = vadd.f32 %v467_v29, %v1418_v61 }
 0x125   : > { %v587_v31 = vadd.f32 %v571_v26, %v462_v27  ;;  %v556_v32 = vadd.f32 1.0, %v466_v28 }
 0x126   : > { %v471_v33 = vpop.f32.mrb[10].mxu0 }
 0x127   : > { %v572_v34 = vmul.f32 %v556_v32, %v540_v30  ;;  %v472_v36 = vadd.f32 %v471_v33, %v1408_v57  ;;  %v473_v37 = vpop.f32.mrb[11].mxu0  ;;  %986 = vmatmul.mubr.f32.gmra.mrb[2].mxu1 %v587_v31  ;;  %v548_v32 = vld [vmem:[%s1415_s26 + $0x60] sm:$0xff] }
 0x128   : > { %v474_v43 = vadd.f32 %v473_v37, %v1418_v61 }
 0x129   : > { %v588_v39 = vadd.f32 %v572_v34, %v468_v35  ;;  %v557_v40 = vadd.f32 1.0, %v472_v36 }
 0x12a   : > { %v477_v41 = vpop.f32.mrb[12].mxu0 }
 0x12b   : > { %v573_v42 = vmul.f32 %v557_v40, %v541_v38  ;;  %v478_v44 = vadd.f32 %v477_v41, %v1408_v57  ;;  %v479_v45 = vpop.f32.mrb[13].mxu0  ;;  %988 = vmatprep.mubr.f32.mxu1 %v588_v39  ;;  %v549_v40 = vld [vmem:[%s1415_s26 + $0x68] sm:$0xff] }
 0x12c   : > { %v480_v51 = vadd.f32 %v479_v45, %v1418_v61 }
 0x12d   : > { %v589_v47 = vadd.f32 %v573_v42, %v474_v43  ;;  %v558_v48 = vadd.f32 1.0, %v478_v44 }
 0x12e   : > { %v483_v49 = vpop.f32.mrb[14].mxu0 }
 0x12f   : > { %v574_v50 = vmul.f32 %v558_v48, %v542_v46  ;;  %v484_v52 = vadd.f32 %v483_v49, %v1408_v57  ;;  %v485_v53 = vpop.f32.mrb[15].mxu0  ;;  %989 = vmatmul.mubr.f32.gmra.mrb[4].mxu1 %v589_v47  ;;  %v550_v48 = vld [vmem:[%s1415_s26 + $0x70] sm:$0xff] }
 0x130   : > { %v486_v60 = vadd.f32 %v485_v53, %v1418_v61 }
 0x131   : > { %v590_v55 = vadd.f32 %v574_v50, %v480_v51  ;;  %v559_v56 = vadd.f32 1.0, %v484_v52 }
 0x132   : > { %v489_v58 = vpop.f32.mrb[16].mxu0 }
 0x133   : > { %v575_v59 = vmul.f32 %v559_v56, %v543_v54  ;;  %v490_v62 = vadd.f32 %v489_v58, %v1408_v57  ;;  %v491_v63 = vpop.f32.mrb[17].mxu0  ;;  %991 = vmatprep.mubr.f32.mxu1 %v590_v55  ;;  %v551_v56 = vld [vmem:[%s1415_s26 + $0x78] sm:$0xff] }
 0x134   : > { %v492_v5 = vadd.f32 %v491_v63, %v1418_v61 }
 0x135   : > { %v591_v1 = vadd.f32 %v575_v59, %v486_v60  ;;  %v560_v2 = vadd.f32 1.0, %v490_v62 }
 0x136   : > { %v495_v3 = vpop.f32.mrb[18].mxu0 }
 0x137   : > { %v576_v4 = vmul.f32 %v560_v2, %v544_v0  ;;  %v496_v6 = vadd.f32 %v495_v3, %v1408_v57  ;;  %v497_v7 = vpop.f32.mrb[19].mxu0  ;;  %992 = vmatmul.mubr.f32.gmra.mrb[6].mxu1 %v591_v1  ;;  %v911_v0 = vld [vmem:[%s1548_s5] ss:$0 sm:$0xff] }
 0x138   : > { %v498_v13 = vadd.f32 %v497_v7, %v1418_v61 }
 0x139   : > { %v592_v9 = vadd.f32 %v576_v4, %v492_v5  ;;  %v561_v10 = vadd.f32 1.0, %v496_v6 }
 0x13a   : > { %v501_v11 = vpop.f32.mrb[20].mxu0 }
 0x13b   : > { %v577_v12 = vmul.f32 %v561_v10, %v545_v8  ;;  %v502_v14 = vadd.f32 %v501_v11, %v1408_v57  ;;  %v503_v15 = vpop.f32.mrb[21].mxu0  ;;  %994 = vmatprep.mubr.f32.mxu1 %v592_v9 }
 0x13c   : > { %v504_v21 = vadd.f32 %v503_v15, %v1418_v61 }
 0x13d   : > { %v593_v17 = vadd.f32 %v577_v12, %v498_v13  ;;  %v562_v18 = vadd.f32 1.0, %v502_v14 }
 0x13e   : > { %v507_v19 = vpop.f32.mrb[22].mxu0 }
 0x13f   : > { %v578_v20 = vmul.f32 %v562_v18, %v546_v16  ;;  %v508_v22 = vadd.f32 %v507_v19, %v1408_v57  ;;  %v509_v23 = vpop.f32.mrb[23].mxu0  ;;  %995 = vmatmul.mubr.f32.gmra.mrb[8].mxu1 %v593_v17 }
 0x140   : > { %v510_v29 = vadd.f32 %v509_v23, %v1418_v61 }
 0x141   : > { %v594_v25 = vadd.f32 %v578_v20, %v504_v21  ;;  %v563_v26 = vadd.f32 1.0, %v508_v22 }
 0x142   : > { %v513_v27 = vpop.f32.mrb[24].mxu0 }
 0x143   : > { %v579_v28 = vmul.f32 %v563_v26, %v547_v24  ;;  %v514_v30 = vadd.f32 %v513_v27, %v1408_v57  ;;  %v515_v31 = vpop.f32.mrb[25].mxu0  ;;  %997 = vmatprep.mubr.f32.mxu1 %v594_v25 }
 0x144   : > { %v516_v37 = vadd.f32 %v515_v31, %v1418_v61 }
 0x145   : > { %v595_v33 = vadd.f32 %v579_v28, %v510_v29  ;;  %v564_v34 = vadd.f32 1.0, %v514_v30 }
 0x146   : > { %v519_v35 = vpop.f32.mrb[26].mxu0 }
 0x147   : > { %v580_v36 = vmul.f32 %v564_v34, %v548_v32  ;;  %v520_v38 = vadd.f32 %v519_v35, %v1408_v57  ;;  %v521_v39 = vpop.f32.mrb[27].mxu0  ;;  %998 = vmatmul.mubr.f32.gmra.mrb[10].mxu1 %v595_v33 }
 0x148   : > { %v522_v45 = vadd.f32 %v521_v39, %v1418_v61 }
 0x149   : > { %v596_v41 = vadd.f32 %v580_v36, %v516_v37  ;;  %v565_v42 = vadd.f32 1.0, %v520_v38 }
 0x14a   : > { %v525_v43 = vpop.f32.mrb[28].mxu0 }
 0x14b   : > { %v581_v44 = vmul.f32 %v565_v42, %v549_v40  ;;  %v526_v46 = vadd.f32 %v525_v43, %v1408_v57  ;;  %v527_v47 = vpop.f32.mrb[29].mxu0  ;;  %1000 = vmatprep.mubr.f32.mxu1 %v596_v41 }
 0x14c   : > { %v528_v53 = vadd.f32 %v527_v47, %v1418_v61 }
 0x14d   : > { %v597_v49 = vadd.f32 %v581_v44, %v522_v45  ;;  %v566_v50 = vadd.f32 1.0, %v526_v46 }
 0x14e   : > { %v531_v51 = vpop.f32.mrb[30].mxu0 }
 0x14f   : > { %v582_v52 = vmul.f32 %v566_v50, %v550_v48  ;;  %v532_v54 = vadd.f32 %v531_v51, %v1408_v57  ;;  %v533_v55 = vpop.f32.mrb[31].mxu0  ;;  %1001 = vmatmul.mubr.f32.gmra.mrb[12].mxu1 %v597_v49 }
 0x150   : > { %v534_v62 = vadd.f32 %v533_v55, %v1418_v61 }
 0x151   : > { %v598_v58 = vadd.f32 %v582_v52, %v528_v53  ;;  %v567_v59 = vadd.f32 1.0, %v532_v54 }
 0x153   : > { %v583_v60 = vmul.f32 %v567_v59, %v551_v56  ;;  %1003 = vmatprep.mubr.f32.mxu1 %v598_v58 }
 0x155   : > { %v599_v63 = vadd.f32 %v583_v60, %v534_v62 }
 0x157   : > { %1004 = vmatmul.mubr.f32.gmra.mrb[14].mxu1 %v599_v63 }
 0x1f2   : > { %v984_v1 = vpop.f32.mrb[0].mxu1 }
 0x1f3   : > { %v695_v57 = vadd.f32 %v984_v1, %v911_v0  ;;  %v689_v2 = vpop.f32.mrb[1].mxu1 }
 0x1f4   : > { %v690_v3 = vadd.f32 %v911_v0, %v689_v2 }
 0x1f5   : > { %769 = vst [vmem:[%s1473_s12 + $0x8] sm:$0xff] %v695_v57 }
 0x1f6   : > { %768 = vst [vmem:[%s1473_s12] sm:$0xff] %v690_v3 }
 0x1fa   : > { %v987_v61 = vpop.f32.mrb[2].mxu1 }
 0x1fb   : > { %v705_v4 = vadd.f32 %v987_v61, %v911_v0  ;;  %v699_v5 = vpop.f32.mrb[3].mxu1 }
 0x1fc   : > { %v700_v6 = vadd.f32 %v911_v0, %v699_v5 }
 0x1fd   : > { %771 = vst [vmem:[%s1473_s12 + $0x18] sm:$0xff] %v705_v4 }
 0x1fe   : > { %770 = vst [vmem:[%s1473_s12 + $0x10] sm:$0xff] %v700_v6 }
 0x202   : > { %v990_v7 = vpop.f32.mrb[4].mxu1 }
 0x203   : > { %v715_v8 = vadd.f32 %v990_v7, %v911_v0  ;;  %v709_v9 = vpop.f32.mrb[5].mxu1 }
 0x204   : > { %v710_v10 = vadd.f32 %v911_v0, %v709_v9 }
 0x205   : > { %773 = vst [vmem:[%s1473_s12 + $0x28] sm:$0xff] %v715_v8 }
 0x206   : > { %772 = vst [vmem:[%s1473_s12 + $0x20] sm:$0xff] %v710_v10 }
 0x20a   : > { %v993_v11 = vpop.f32.mrb[6].mxu1 }
 0x20b   : > { %v725_v12 = vadd.f32 %v993_v11, %v911_v0  ;;  %v719_v13 = vpop.f32.mrb[7].mxu1 }
 0x20c   : > { %v720_v14 = vadd.f32 %v911_v0, %v719_v13 }
 0x20d   : > { %775 = vst [vmem:[%s1473_s12 + $0x38] sm:$0xff] %v725_v12 }
 0x20e   : > { %774 = vst [vmem:[%s1473_s12 + $0x30] sm:$0xff] %v720_v14 }
 0x212   : > { %v996_v15 = vpop.f32.mrb[8].mxu1 }
 0x213   : > { %v735_v16 = vadd.f32 %v996_v15, %v911_v0  ;;  %v729_v17 = vpop.f32.mrb[9].mxu1 }
 0x214   : > { %v730_v18 = vadd.f32 %v911_v0, %v729_v17 }
 0x215   : > { %777 = vst [vmem:[%s1473_s12 + $0x48] sm:$0xff] %v735_v16 }
 0x216   : > { %776 = vst [vmem:[%s1473_s12 + $0x40] sm:$0xff] %v730_v18 }
 0x21a   : > { %v999_v19 = vpop.f32.mrb[10].mxu1 }
 0x21b   : > { %v745_v20 = vadd.f32 %v999_v19, %v911_v0  ;;  %v739_v21 = vpop.f32.mrb[11].mxu1 }
 0x21c   : > { %v740_v22 = vadd.f32 %v911_v0, %v739_v21 }
 0x21d   : > { %779 = vst [vmem:[%s1473_s12 + $0x58] sm:$0xff] %v745_v20 }
 0x21e   : > { %778 = vst [vmem:[%s1473_s12 + $0x50] sm:$0xff] %v740_v22 }
 0x222   : > { %v1002_v23 = vpop.f32.mrb[12].mxu1 }
 0x223   : > { %v755_v24 = vadd.f32 %v1002_v23, %v911_v0  ;;  %v749_v25 = vpop.f32.mrb[13].mxu1 }
 0x224   : > { %v750_v26 = vadd.f32 %v911_v0, %v749_v25 }
 0x225   : > { %781 = vst [vmem:[%s1473_s12 + $0x68] sm:$0xff] %v755_v24 }
 0x226   : > { %780 = vst [vmem:[%s1473_s12 + $0x60] sm:$0xff] %v750_v26 }
 0x22a   : > { %v1005_v27 = vpop.f32.mrb[14].mxu1 }
 0x22b   : > { %v765_v28 = vadd.f32 %v1005_v27, %v911_v0  ;;  %v759_v29 = vpop.f32.mrb[15].mxu1 }
 0x22c   : > { %v760_v30 = vadd.f32 %v911_v0, %v759_v29 }
 0x22d   : > { %783 = vst [vmem:[%s1473_s12 + $0x78] sm:$0xff] %v765_v28 }
 0x22e   : > { %782 = vst [vmem:[%s1473_s12 + $0x70] sm:$0xff] %v760_v30 }
 0x22f   : > { %1142 = shalt.err (!%p1139_p7)
}
 0x230   : > { %s1143_s26 = scalar_lea.hbm %s1494_s16, 2048  ;;  %s1147_s29 = scalar_lea.hbm %s1549_s6, 4096 }
 0x231   : > { %p1144_p8 = scmp.ne.s32.totalorder %s1494_s16, %s1143_s26  ;;  %p1148_p1 = scmp.lt.u32.totalorder %s1494_s16, %s1549_s6 }
 0x232   : > { %p1149_p0 = scmp.lt.u32.totalorder %s1147_s29, %s1143_s26  ;;  %p1151_p6 = scmp.lt.u32.totalorder %s1143_s26, %s1494_s16 }
 0x233   : > { %p1145_p11 = pnand %p1144_p8, %p1560_p9 }
 0x234   : > { %p1150_p5 = por %p1149_p0, %p1148_p1 }
 0x235   : > { %p1146_p13 = pneg %p1145_p11 }
 0x236   : > { %p1152_p10 = por %p1151_p6, %p1150_p5 }
 0x238   : > { %p1153_p12 = pnand %p1152_p10, %p1146_p13 }
 0x23a   : > { %1156 = shalt.err (!%p1153_p12)
}
 0x23b   : > { %s1202_s14 = smov 128   ;;  %s1203_s11 = smov 8  }
 0x23c   : > { %1050 = dma.vmem_to_hbm [thread:$0]  (%p1560_p9), %s1496_s9, 2048, %s1494_s16, %s1502_s17, %s1202_s14, %s1202_s14, %s1203_s11  }
 0x23d PF: > { %p1062_p2 = scmp.ge.s32.totalorder %s1195_s24, 2  ;;  %s813_s15 = sand.u32 1, %s1183_s21  }
 0x23e   : > { %p1561_p3 = scmp.ne.s32.totalorder %s1554_s8, 0  ;;  %s814_s25 = scalar_lea.sflag [#allocation4], %s813_s15 }
 0x240   : > { %p1057_p4 = pnand %p1062_p2, %p1561_p3 }
 0x242   : > { %1178 = dma.done.wait (!%p1057_p4), %s814_s25, 2048  }
 0x243   : > { %1180 = vsyncadd (!%p1057_p4), %s814_s25, 4294965248  ;;  %p17_p7 = scmp.ge.s32.totalorder %s1264_s27, 4   ;;  %s1562_s21 = smov %s1187_s22 }
 0x244   : > { %s1563_s22 = smov %s1191_s23  ;;  %s1564_s23 = smov %s1275_s30 }
 0x245   : > { %s1565_s24 = smov %s1264_s27  ;;  %19 = sbr.rel (!%p17_p7) target bundleno = 4 (0x4), region = 87 }
 0x24c   :  { %819 = vsyncpa [#allocation3], 1 }
 0x24d   :  { %821 = vsyncpa [#allocation3 + $0x1], 1 }
 0x24e   :  { %822 = vsyncpa [#allocation4], 1 }
 0x24f   :  { %824 = vsyncpa [#allocation4 + $0x1], 1 }

</bundles_post_ra>
